<compile_context>
chip_gen: v6e
topology: v6e:2x2x1
jax: 0.10.0
libtpu: 0.0.40
codegen_flags: <defaults>
</compile_context>

<pallas_src>
import jax
import jax.numpy as jnp
from jax.experimental import pallas as pl
from jax.experimental.pallas import tpu as pltpu


# ---------------------------------------------------------------------------
# Tile selection helpers (trace-time, operate on static Python ints).
# ---------------------------------------------------------------------------

def _round_up(x, m):
    return ((x + m - 1) // m) * m


def _pick_row_tile(batch, *, max_rows=4096, split_threshold=1024):
    """Row (sublane) tile for the batch-major kernel."""
    if batch <= split_threshold:
        # One grid step: this regime is pure launch/step overhead; fewer steps
        # is the only lever that shows up in wall time (v5e/v6e note).
        return _round_up(batch, 8)
    # >= 2 balanced tiles so v7x's two TensorCores both participate; cap the
    # block so the lane-padded (TB, 128) VMEM buffer stays ~2 MiB.
    n_blocks = max(2, pl.cdiv(batch, max_rows))
    return _round_up(pl.cdiv(batch, n_blocks), 8)


def _pick_lane_tile(batch, *, max_lanes=32768, split_threshold=2048):
    """Lane tile for the feature-major kernel (batch on lanes)."""
    if batch <= split_threshold:
        return _round_up(batch, 128)
    n_blocks = max(2, pl.cdiv(batch, max_lanes))
    return _round_up(pl.cdiv(batch, n_blocks), 128)


# ---------------------------------------------------------------------------
# Kernels.
# ---------------------------------------------------------------------------

def _dqn_batch_major_kernel(params_ref, state_ref, out_ref):
    # params_ref: (F,) f32 in SMEM (scalar reads)
    # state_ref : (TB, F) f32 in VMEM (batch on sublanes, F=4 on lanes)
    # out_ref   : (TB, 1) f32 in VMEM
    s = state_ref[...]
    f_dim = s.shape[1]
    # Unrolled at trace time (F == 4): scalar * vector FMAs on the VPU only.
    acc = s[:, 0:1] * params_ref[0]
    for f in range(1, f_dim):
        acc = acc + s[:, f:f + 1] * params_ref[f]
    out_ref[...] = acc


def _dqn_feature_major_kernel(params_ref, state_ref, out_ref):
    # params_ref: (F,) f32 in SMEM
    # state_ref : (F, TB) f32 in VMEM (batch on lanes)
    # out_ref   : (1, TB) f32 in VMEM (lane-dense -> unmasked vst)
    s = state_ref[...]
    f_dim = s.shape[0]
    acc = s[0:1, :] * params_ref[0]
    for f in range(1, f_dim):
        acc = acc + s[f:f + 1, :] * params_ref[f]
    out_ref[...] = acc


# ---------------------------------------------------------------------------
# Wrappers.
# ---------------------------------------------------------------------------

@jax.jit
def dqn_forward(state, params):
    """state: (B, F) batch-major (natural torch layout); params: (F,).

    Returns matmul(state, params).squeeze(): (B,) for B > 1, scalar for B == 1.
    """
    batch, feat = state.shape
    assert params.shape == (feat,)
    tb = _pick_row_tile(batch)
    out = pl.pallas_call(
        _dqn_batch_major_kernel,
        out_shape=jax.ShapeDtypeStruct((batch, 1), state.dtype),
        grid=(pl.cdiv(batch, tb),),
        in_specs=[
            # params: whole (F,) array resident in SMEM for scalar reads.
            pl.BlockSpec(memory_space=pltpu.MemorySpace.SMEM),
            # state: (TB, F) row tile; F equals the full minor dim.
            pl.BlockSpec((tb, feat), lambda i: (i, 0)),
        ],
        out_specs=pl.BlockSpec((tb, 1), lambda i: (i, 0)),
        compiler_params=pltpu.CompilerParams(
            dimension_semantics=("parallel",),
        ),
    )(params, state)
    # (B, 1) -> (B,) (or () when B == 1, matching torch .squeeze()); this is a
    # contiguous reshape, i.e. a bitcast — no extra HBM pass.
    return jnp.squeeze(out)


@jax.jit
def dqn_forward_feature_major(state_fm, params):
    """state_fm: (F, B) feature-major state (producer stores batch transposed).

    Keeps batch on the lane axis -> lane-dense (1, TB) output stores; preferred
    for large replay-batch evaluation (no transpose HLO is emitted here).
    """
    feat, batch = state_fm.shape
    assert params.shape == (feat,)
    tb = _pick_lane_tile(batch)
    out = pl.pallas_call(
        _dqn_feature_major_kernel,
        out_shape=jax.ShapeDtypeStruct((1, batch), state_fm.dtype),
        grid=(pl.cdiv(batch, tb),),
        in_specs=[
            pl.BlockSpec(memory_space=pltpu.MemorySpace.SMEM),
            pl.BlockSpec((feat, tb), lambda i: (0, i)),
        ],
        out_specs=pl.BlockSpec((1, tb), lambda i: (0, i)),
        compiler_params=pltpu.CompilerParams(
            dimension_semantics=("parallel",),
        ),
    )(params, state_fm)
    return jnp.squeeze(out)


# ---------------------------------------------------------------------------
# Self-test.
# ---------------------------------------------------------------------------

if __name__ == "__main__":
    key = jax.random.PRNGKey(0)
    k_state, k_params = jax.random.split(key)

    feat = 4  # fixed by nn.Parameter(torch.rand(4))
    params = jax.random.uniform(k_params, (feat,), dtype=jnp.float32)

    # Typical small DQN batch (batch-major, the natural torch layout).
    batch = 32
    state = jax.random.uniform(k_state, (batch, feat), dtype=jnp.float32)
    out = jax.block_until_ready(dqn_forward(state, params))
    ref = jnp.matmul(state, params)
    assert out.shape == (batch,), out.shape
    assert jnp.allclose(out, ref, atol=1e-5, rtol=1e-5)

    # Ragged (non-multiple-of-8) batch: exercises dropped OOB writes.
    state_r = jax.random.uniform(k_state, (37, feat), dtype=jnp.float32)
    out_r = jax.block_until_ready(dqn_forward(state_r, params))
    assert out_r.shape == (37,), out_r.shape
    assert jnp.allclose(out_r, jnp.matmul(state_r, params), atol=1e-5, rtol=1e-5)

    # batch == 1: torch .squeeze() collapses to a scalar.
    state_1 = jax.random.uniform(k_state, (1, feat), dtype=jnp.float32)
    out_1 = jax.block_until_ready(dqn_forward(state_1, params))
    assert out_1.shape == (), out_1.shape
    assert jnp.allclose(out_1, jnp.matmul(state_1, params)[0], atol=1e-5, rtol=1e-5)

    # Feature-major path (producer stores the batch as (F, B)): lane-dense
    # output; the .T below is test plumbing only, not part of the hot path.
    batch_fm = 300
    state_fm = jax.random.uniform(k_state, (batch_fm, feat), dtype=jnp.float32).T
    out_fm = jax.block_until_ready(dqn_forward_feature_major(state_fm, params))
    assert out_fm.shape == (batch_fm,), out_fm.shape
    assert jnp.allclose(out_fm, jnp.matmul(state_fm.T, params), atol=1e-5, rtol=1e-5)

    print("KERNEL_OK")
</pallas_src>

<mosaic_0001>
module attributes {stable_mosaic.version = 11 : i64} {
  func.func @_dqn_batch_major_kernel(%arg0: i32, %arg1: memref<4xf32, #tpu.memory_space<smem>>, %arg2: memref<32x4xf32, #tpu.memory_space<vmem>>, %arg3: memref<32x1xf32, #tpu.memory_space<vmem>>) attributes {dimension_semantics = [#tpu.dimension_semantics<parallel>], iteration_bounds = array<i64: 1>, scalar_prefetch = 0 : i64, scratch_operands = 0 : i64, tpu.core_type = #tpu.core_type<tc>, window_params = [{transform_indices = @transform_0, window_bounds = array<i64: 4>}, {transform_indices = @transform_1, window_bounds = array<i64: 32, 4>}, {transform_indices = @transform_2, window_bounds = array<i64: 32, 1>}]} {
    %c0 = arith.constant 0 : index
    %c0_0 = arith.constant 0 : index
    %0 = vector.load %arg2[%c0, %c0_0] : memref<32x4xf32, #tpu.memory_space<vmem>>, vector<32x4xf32>
    %1 = vector.extract_strided_slice %0 {offsets = [0, 0], sizes = [32, 1], strides = [1, 1]} : vector<32x4xf32> to vector<32x1xf32>
    %c0_1 = arith.constant 0 : index
    %2 = memref.load %arg1[%c0_1] : memref<4xf32, #tpu.memory_space<smem>>
    %3 = vector.broadcast %2 : f32 to vector<32x1xf32>
    %4 = arith.mulf %1, %3 : vector<32x1xf32>
    %5 = vector.extract_strided_slice %0 {offsets = [0, 1], sizes = [32, 1], strides = [1, 1]} : vector<32x4xf32> to vector<32x1xf32>
    %c1 = arith.constant 1 : index
    %6 = memref.load %arg1[%c1] : memref<4xf32, #tpu.memory_space<smem>>
    %7 = vector.broadcast %6 : f32 to vector<32x1xf32>
    %8 = arith.mulf %5, %7 : vector<32x1xf32>
    %9 = arith.addf %4, %8 : vector<32x1xf32>
    %10 = vector.extract_strided_slice %0 {offsets = [0, 2], sizes = [32, 1], strides = [1, 1]} : vector<32x4xf32> to vector<32x1xf32>
    %c2 = arith.constant 2 : index
    %11 = memref.load %arg1[%c2] : memref<4xf32, #tpu.memory_space<smem>>
    %12 = vector.broadcast %11 : f32 to vector<32x1xf32>
    %13 = arith.mulf %10, %12 : vector<32x1xf32>
    %14 = arith.addf %9, %13 : vector<32x1xf32>
    %15 = vector.extract_strided_slice %0 {offsets = [0, 3], sizes = [32, 1], strides = [1, 1]} : vector<32x4xf32> to vector<32x1xf32>
    %c3 = arith.constant 3 : index
    %16 = memref.load %arg1[%c3] : memref<4xf32, #tpu.memory_space<smem>>
    %17 = vector.broadcast %16 : f32 to vector<32x1xf32>
    %18 = arith.mulf %15, %17 : vector<32x1xf32>
    %19 = arith.addf %14, %18 : vector<32x1xf32>
    %c0_2 = arith.constant 0 : index
    %c0_3 = arith.constant 0 : index
    %20 = vector.load %arg3[%c0_2, %c0_3] : memref<32x1xf32, #tpu.memory_space<vmem>>, vector<32x1xf32>
    tpu.vector_store %arg3[%c0_2, %c0_3], %19 {strides = array<i32>} : memref<32x1xf32, #tpu.memory_space<vmem>>, vector<32x1xf32>,
    return
  }
  func.func @transform_0(%arg0: i32) -> i32 {
    %c0_i32 = arith.constant 0 : i32
    %c0_i32_0 = arith.constant 0 : i32
    return %c0_i32 : i32
  }
  func.func @transform_1(%arg0: i32) -> (i32, i32) {
    %c0_i32 = arith.constant 0 : i32
    %c0_i32_0 = arith.constant 0 : i32
    return %arg0, %c0_i32 : i32, i32
  }
  func.func @transform_2(%arg0: i32) -> (i32, i32) {
    %c0_i32 = arith.constant 0 : i32
    %c0_i32_0 = arith.constant 0 : i32
    return %arg0, %c0_i32 : i32, i32
  }
}

</mosaic_0001>

<bundles_post_ra>
// kernel: dqn_forward.1
= control target key start
LH: loop header
LB: loop body
LE: loop exit
PB: predicated region body
PF: predicated region fallthrough
CT: control target
= control target key end

     0   :  { %7 = vsyncpa [#allocation3], 0  ;;  %s193_s0 = inlined_call_operand.vmem [shape: f32[4], index: 0, kind: input, shape index: {}]   ;;  %s194_s1 = inlined_call_operand.vmem [shape: f32[32,4], index: 1, kind: input, shape index: {}]   ;;  %s195_s2 = inlined_call_operand.vmem [shape: f32[32,1], index: 2, kind: output, shape index: {}]  }
   0x1   :  { %s14_s11 = sshll.u32 %s193_s0, 4  ;;  %s15_s11 = int_to_ptr.vmem [resolvable:$true] %s14_s11 }
   0x2   :  { %s129_s12 = scalar_lea.vmem %s15_s11, 16  ;;  %p134_p1 = scmp.lt.s32.totalorder %s15_s11, %s15_s11 }
   0x3   :  { %p130_p0 = scmp.ne.s32.totalorder %s15_s11, %s129_s12  ;;  %p135_p2 = scmp.lt.s32.totalorder %s129_s12, %s129_s12 }
   0x5   :  { %p136_p3 = por %p135_p2, %p134_p1 }
   0x7   :  { %p137_p4 = pnand %p136_p3, %p130_p0 }
   0x9   :  { %140 = shalt.err (!%p137_p4)
}
   0xa   :  { %s143_s13 = smov [#allocation2]  }
   0xb   :  { %17 = dma.vmem_to_smem %s15_s11, 16, %s143_s13, [#allocation3]  }
   0xc   :  { %141 = dma.done.wait [#allocation3], 16  }
   0xd   :  { %142 = vsyncadd [#allocation3], 4294967280 }
   0xe   :  { %23 = sfence }
   0xf   :  { %s122_s14 = sld [smem:[#allocation2 + $0x1]]  ;;  %v26_v0 = vld [vmem:[%s194_s1 + $0x10] sm:$0xff]  ;;  %v24_v1 = vld [vmem:[%s194_s1] sm:$0xff]  ;;  %v27_v3 = vld [vmem:[%s194_s1 + $0x18] sm:$0xff]  ;;  %s144_s23 = smov 127   ;;  %vm112_vm0 = vcmask 7168  }
  0x10   :  { %s123_s15 = sld [smem:[#allocation2 + $0x2]]  ;;  %v25_v4 = vld [vmem:[%s194_s1 + $0x8] sm:$0xff]  ;;  %s145_s25 = smov 126  }
  0x11   :  { %s124_s24 = sld [smem:[#allocation2 + $0x3]]  ;;  %s146_s1 = smov 125  }
  0x12   :  { %s28_s26 = sld [smem:[#allocation2]] }
  0x15   :  { %v35_v2 = vstv %s122_s14 }
  0x16   :  { %v38_v5 = vmul.f32 %v35_v2, %v26_v0  ;;  %v36_v6 = vmul.f32 %v35_v2, %v24_v1  ;;  %v39_v7 = vmul.f32 %v35_v2, %v27_v3  ;;  %v37_v8 = vmul.f32 %v35_v2, %v25_v4 }
  0x17   :  { %v61_v9 = vstv %s123_s15  ;;  %v87_v14 = vstv %s124_s24 }
  0x18   :  { %48 = vrot.lane.b32.xlu1 %v38_v5, %s144_s23  ;;  %44 = vrot.lane.b32.xlu0 %v36_v6, %s144_s23  ;;  %v63_v10 = vmul.f32 %v61_v9, %v25_v4  ;;  %v62_v11 = vmul.f32 %v61_v9, %v24_v1  ;;  %v65_v12 = vmul.f32 %v61_v9, %v27_v3  ;;  %v29_v23 = vstv %s28_s26 }
  0x19   :  { %v64_v13 = vmul.f32 %v61_v9, %v26_v0  ;;  %v89_v15 = vmul.f32 %v87_v14, %v25_v4  ;;  %v88_v16 = vmul.f32 %v87_v14, %v24_v1  ;;  %v91_v17 = vmul.f32 %v87_v14, %v27_v3 }
  0x1a   :  { %v90_v18 = vmul.f32 %v87_v14, %v26_v0  ;;  %v30_v26 = vmul.f32 %v29_v23, %v24_v1  ;;  %v31_v27 = vmul.f32 %v29_v23, %v25_v4  ;;  %v32_v30 = vmul.f32 %v29_v23, %v26_v0 }
  0x1b   :  { %v33_v32 = vmul.f32 %v29_v23, %v27_v3 }
  0x1c   :  { %50 = vrot.lane.b32.xlu1 %v39_v7, %s144_s23  ;;  %46 = vrot.lane.b32.xlu0 %v37_v8, %s144_s23 }
  0x20   :  { %72 = vrot.lane.b32.xlu1 %v63_v10, %s145_s25  ;;  %70 = vrot.lane.b32.xlu0 %v62_v11, %s145_s25 }
  0x24   :  { %76 = vrot.lane.b32.xlu1 %v65_v12, %s145_s25  ;;  %74 = vrot.lane.b32.xlu0 %v64_v13, %s145_s25 }
  0x28   :  { %98 = vrot.lane.b32.xlu1 %v89_v15, %s146_s1  ;;  %96 = vrot.lane.b32.xlu0 %v88_v16, %s146_s1 }
  0x2c   :  { %102 = vrot.lane.b32.xlu1 %v91_v17, %s146_s1  ;;  %100 = vrot.lane.b32.xlu0 %v90_v18, %s146_s1 }
  0x8a   :  { %v49_v19 = vpop.permute.xlu1 %48  ;;  %v45_v20 = vpop.permute.xlu0 %44 }
  0x8b   :  { %v56_v31 = vadd.f32 %v45_v20, %v30_v26  ;;  %v58_v38 = vadd.f32 %v49_v19, %v32_v30 }
  0x8e   :  { %v51_v21 = vpop.permute.xlu1 %50  ;;  %v47_v22 = vpop.permute.xlu0 %46 }
  0x8f   :  { %v57_v33 = vadd.f32 %v47_v22, %v31_v27  ;;  %v59_v39 = vadd.f32 %v51_v21, %v33_v32 }
  0x92   :  { %v73_v24 = vpop.permute.xlu1 %72  ;;  %v71_v25 = vpop.permute.xlu0 %70 }
  0x93   :  { %v83_v34 = vadd.f32 %v73_v24, %v57_v33  ;;  %v82_v35 = vadd.f32 %v71_v25, %v56_v31 }
  0x96   :  { %v77_v28 = vpop.permute.xlu1 %76  ;;  %v75_v29 = vpop.permute.xlu0 %74 }
  0x97   :  { %v85_v42 = vadd.f32 %v77_v28, %v59_v39  ;;  %v84_v43 = vadd.f32 %v75_v29, %v58_v38 }
  0x9a   :  { %v99_v36 = vpop.permute.xlu1 %98  ;;  %v97_v37 = vpop.permute.xlu0 %96 }
  0x9b   :  { %v109_v40 = vadd.f32 %v99_v36, %v83_v34  ;;  %v108_v41 = vadd.f32 %v97_v37, %v82_v35 }
  0x9d   :  { %114 = vst.msk [vmem:[%s195_s2 + $0x8] sm:$0xff] %vm112_vm0, %v109_v40  ;;  %113 = vst.msk [vmem:[%s195_s2] sm:$0xff] %vm112_vm0, %v108_v41 }
  0x9e   :  { %v103_v44 = vpop.permute.xlu1 %102  ;;  %v101_v45 = vpop.permute.xlu0 %100 }
  0x9f   :  { %v111_v46 = vadd.f32 %v103_v44, %v85_v42  ;;  %v110_v47 = vadd.f32 %v101_v45, %v84_v43 }
  0xa1   :  { %116 = vst.msk [vmem:[%s195_s2 + $0x18] sm:$0xff] %vm112_vm0, %v111_v46  ;;  %115 = vst.msk [vmem:[%s195_s2 + $0x10] sm:$0xff] %vm112_vm0, %v110_v47 }
  0xa2   :  { %121 = vsyncpa [#allocation3], 1 }

</bundles_post_ra>
